<compile_context>
chip_gen: v6e
topology: v6e:2x2x1
jax: 0.10.0
libtpu: 0.0.40
codegen_flags: <defaults>
</compile_context>

<pallas_src>
import jax
import jax.numpy as jnp
from jax.experimental import pallas as pl
from jax.experimental.pallas import tpu as pltpu

LANES = 128
TILE_BYTES = 4 * 1024 * 1024        # ~4 MiB per array per grid step
SMALL_BYTES = 256 * 1024            # below this, fused XLA beats a pallas_call


def _skip_kernel(w_ref, x1_ref, x2_ref, o_ref):
    # w_ref: (1, 1) float32 scalar in SMEM.
    # (1 - w) * x1 + w * x2  ==  x1 + w * (x2 - x1); compute in f32 for precision.
    w = w_ref[0, 0]
    x1 = x1_ref[...].astype(jnp.float32)
    x2 = x2_ref[...].astype(jnp.float32)
    o_ref[...] = (x1 + (x2 - x1) * w).astype(o_ref.dtype)


def _sublane_multiple(dtype) -> int:
    # Minimum second-minor tile multiple for packed dtypes: f32->8, bf16/f16->16, 8-bit->32.
    return {4: 8, 2: 16, 1: 32}.get(jnp.dtype(dtype).itemsize, 8)


def _xla_fallback(x1, x2, w):
    # Fused XLA path for tiny / unaligned shapes (no kernel launch, no pad/slice).
    w = jnp.asarray(w, dtype=jnp.float32)
    out = x1.astype(jnp.float32) + (x2.astype(jnp.float32) - x1.astype(jnp.float32)) * w
    return out.astype(x1.dtype)


def learnable_skip_connection(x1: jax.Array, x2: jax.Array, weight) -> jax.Array:
    """(1 - weight) * x1 + weight * x2, computed in a Pallas TPU kernel."""
    assert x1.shape == x2.shape, "x1 and x2 must have the same shape"
    if not jnp.issubdtype(x1.dtype, jnp.floating):
        raise TypeError("learnable_skip_connection expects floating-point inputs")

    orig_shape = x1.shape
    dtype = x1.dtype
    itemsize = jnp.dtype(dtype).itemsize
    sub = _sublane_multiple(dtype)
    align = sub * LANES                       # minimal legal (sub, 128) 2D view
    n = x1.size
    data_bytes = n * itemsize

    # Small tensors or non-(sub,128)-aligned element counts: fused XLA is strictly
    # better (no launch cost, no extra pad/slice HBM traffic).
    if data_bytes < SMALL_BYTES or n % align != 0:
        return _xla_fallback(x1, x2, weight)

    # Lane-dense view: widest last dim (multiple of 128) that keeps rows a multiple of `sub`.
    width = LANES
    for cand in (1024, 512, 256):
        if n % (sub * cand) == 0:
            width = cand
            break
    rows = n // width                          # multiple of `sub` by construction

    # Row tile sized so each array moves ~TILE_BYTES per grid step.
    bt = max(sub, ((TILE_BYTES // itemsize) // width) // sub * sub)

    # Guarantee enough grid steps for megacore (v7x: 2 TCs on the "parallel" axis).
    if data_bytes >= (4 << 20):
        min_steps = 4
    elif data_bytes >= (1 << 20):
        min_steps = 2
    else:
        min_steps = 1
    if min_steps > 1:
        bt_cap = max(sub, ((rows // min_steps) // sub) * sub)
        bt = min(bt, bt_cap)
    bt = min(bt, rows)

    grid = (pl.cdiv(rows, bt),)                # partial tail block handled by Pallas

    a = x1.reshape(rows, width)
    b = x2.reshape(rows, width)
    w = jnp.asarray(weight, dtype=jnp.float32).reshape(1, 1)

    out = pl.pallas_call(
        _skip_kernel,
        out_shape=jax.ShapeDtypeStruct((rows, width), dtype),
        grid_spec=pltpu.PrefetchScalarGridSpec(
            num_scalar_prefetch=0,
            grid=grid,
            in_specs=[
                pl.BlockSpec(memory_space=pltpu.MemorySpace.SMEM),  # weight scalar
                pl.BlockSpec((bt, width), lambda i: (i, 0)),        # x1 tile
                pl.BlockSpec((bt, width), lambda i: (i, 0)),        # x2 tile
            ],
            out_specs=pl.BlockSpec((bt, width), lambda i: (i, 0)),
        ),
        compiler_params=pltpu.CompilerParams(
            dimension_semantics=("parallel",),        # v7x: split stream over 2 TCs
            vmem_limit_bytes=40 * 1024 * 1024,        # 3 arrays x 2 bufs x 4 MiB = 24 MiB
        ),
    )(w, a, b)

    return out.reshape(orig_shape)


if __name__ == "__main__":
    key = jax.random.PRNGKey(0)
    k1, k2, k3, k4 = jax.random.split(key, 4)

    # Deterministic parameter init, matching nn.Parameter(torch.as_tensor(0.01)).
    weight = jnp.float32(0.01)

    def ref_fn(a, b):
        w = jnp.float32(weight)
        return ((1.0 - w) * a.astype(jnp.float32) + w * b.astype(jnp.float32)).astype(a.dtype)

    # 1) f32, 1 MiB tensor: Pallas path with >= 2 grid steps (megacore-friendly).
    x1 = jax.random.normal(k1, (2, 8, 128, 128), dtype=jnp.float32)
    x2 = jax.random.normal(k2, (2, 8, 128, 128), dtype=jnp.float32)
    out = jax.block_until_ready(learnable_skip_connection(x1, x2, weight))
    assert out.shape == x1.shape and out.dtype == x1.dtype
    assert jnp.allclose(out, ref_fn(x1, x2), atol=1e-5, rtol=1e-5)

    # 2) bf16 inputs: kernel upcasts to f32 internally, output stays bf16.
    x1b = x1.astype(jnp.bfloat16)
    x2b = x2.astype(jnp.bfloat16)
    outb = jax.block_until_ready(learnable_skip_connection(x1b, x2b, weight))
    assert outb.dtype == jnp.bfloat16
    assert jnp.allclose(outb.astype(jnp.float32),
                        ref_fn(x1b, x2b).astype(jnp.float32), atol=2e-2, rtol=2e-2)

    # 3) Module-typical tiny shape: short-circuits to fused XLA (no kernel launch).
    t1 = jax.random.normal(k3, (2, 4, 16, 16), dtype=jnp.float32)
    t2 = jax.random.normal(k4, (2, 4, 16, 16), dtype=jnp.float32)
    outt = jax.block_until_ready(learnable_skip_connection(t1, t2, weight))
    assert outt.shape == t1.shape and outt.dtype == t1.dtype
    assert jnp.allclose(outt, ref_fn(t1, t2), atol=1e-6, rtol=1e-6)

    # 4) Unaligned element count: fused XLA fallback (no pad/slice HBM traffic).
    y1 = jax.random.normal(k3, (3, 5, 7, 11), dtype=jnp.float32)
    y2 = jax.random.normal(k4, (3, 5, 7, 11), dtype=jnp.float32)
    outy = jax.block_until_ready(learnable_skip_connection(y1, y2, weight))
    assert outy.shape == y1.shape
    assert jnp.allclose(outy, ref_fn(y1, y2), atol=1e-6, rtol=1e-6)

    print("KERNEL_OK")
</pallas_src>

<mosaic_0001>
module attributes {stable_mosaic.version = 11 : i64} {
  func.func @_skip_kernel(%arg0: i32, %arg1: memref<1x1xf32, #tpu.memory_space<smem>>, %arg2: memref<128x1024xf32, #tpu.memory_space<vmem>>, %arg3: memref<128x1024xf32, #tpu.memory_space<vmem>>, %arg4: memref<128x1024xf32, #tpu.memory_space<vmem>>) attributes {dimension_semantics = [#tpu.dimension_semantics<parallel>], iteration_bounds = array<i64: 2>, scalar_prefetch = 0 : i64, scratch_operands = 0 : i64, tpu.core_type = #tpu.core_type<tc>, window_params = [{transform_indices = @transform_0, window_bounds = array<i64: 1, 1>}, {transform_indices = @transform_1, window_bounds = array<i64: 128, 1024>}, {transform_indices = @transform_2, window_bounds = array<i64: 128, 1024>}, {transform_indices = @transform_3, window_bounds = array<i64: 128, 1024>}]} {
    %c0 = arith.constant 0 : index
    %c0_0 = arith.constant 0 : index
    %0 = memref.load %arg1[%c0, %c0_0] : memref<1x1xf32, #tpu.memory_space<smem>>
    %c0_1 = arith.constant 0 : index
    %c0_2 = arith.constant 0 : index
    %1 = vector.load %arg2[%c0_1, %c0_2] : memref<128x1024xf32, #tpu.memory_space<vmem>>, vector<128x1024xf32>
    %c0_3 = arith.constant 0 : index
    %c0_4 = arith.constant 0 : index
    %2 = vector.load %arg3[%c0_3, %c0_4] : memref<128x1024xf32, #tpu.memory_space<vmem>>, vector<128x1024xf32>
    %3 = arith.subf %2, %1 : vector<128x1024xf32>
    %4 = vector.broadcast %0 : f32 to vector<128x1024xf32>
    %5 = arith.mulf %3, %4 : vector<128x1024xf32>
    %6 = arith.addf %1, %5 : vector<128x1024xf32>
    %c0_5 = arith.constant 0 : index
    %c0_6 = arith.constant 0 : index
    %7 = vector.load %arg4[%c0_5, %c0_6] : memref<128x1024xf32, #tpu.memory_space<vmem>>, vector<128x1024xf32>
    tpu.vector_store %arg4[%c0_5, %c0_6], %6 {strides = array<i32>} : memref<128x1024xf32, #tpu.memory_space<vmem>>, vector<128x1024xf32>,
    return
  }
  func.func @transform_0(%arg0: i32) -> (i32, i32) {
    %c0_i32 = arith.constant 0 : i32
    %c0_i32_0 = arith.constant 0 : i32
    %c0_i32_1 = arith.constant 0 : i32
    return %c0_i32, %c0_i32_0 : i32, i32
  }
  func.func @transform_1(%arg0: i32) -> (i32, i32) {
    %c0_i32 = arith.constant 0 : i32
    %c0_i32_0 = arith.constant 0 : i32
    return %arg0, %c0_i32 : i32, i32
  }
  func.func @transform_2(%arg0: i32) -> (i32, i32) {
    %c0_i32 = arith.constant 0 : i32
    %c0_i32_0 = arith.constant 0 : i32
    return %arg0, %c0_i32 : i32, i32
  }
  func.func @transform_3(%arg0: i32) -> (i32, i32) {
    %c0_i32 = arith.constant 0 : i32
    %c0_i32_0 = arith.constant 0 : i32
    return %arg0, %c0_i32 : i32, i32
  }
}

</mosaic_0001>

<bundles_post_ra>
// kernel: tpu_custom_call.1
= control target key start
LH: loop header
LB: loop body
LE: loop exit
PB: predicated region body
PF: predicated region fallthrough
CT: control target
= control target key end

     0   :  { %s2098_s0 = inlined_call_operand.<no memory space> [shape: f32[1,1], index: 0, kind: input, shape index: {}]   ;;  %s2099_s1 = inlined_call_operand.hbm [shape: f32[256,1024], index: 1, kind: input, shape index: {}]   ;;  %s2100_s2 = inlined_call_operand.hbm [shape: f32[256,1024], index: 2, kind: input, shape index: {}]   ;;  %s2101_s3 = inlined_call_operand.hbm [shape: f32[256,1024], index: 3, kind: output, shape index: {}]  }
   0x1   :  { %8 = sst [smem:[#allocation2]] %s2098_s0 }
   0x2   :  { %9 = vsyncpa [#allocation4], 0 }
   0x3   :  { %11 = vsyncpa [#allocation4 + $0x1], 0 }
   0x4   :  { %12 = vsyncpa [#allocation7], 0 }
   0x5   :  { %14 = vsyncpa [#allocation7 + $0x1], 0 }
   0x6   :  { %15 = vsyncpa [#allocation5], 0 }
   0x7   :  { %17 = vsyncpa [#allocation5 + $0x1], 0  ;;  %s1354_s14 = smov 0   ;;  %s1356_s15 = smov 0  }
   0x8   :  { %s1358_s16 = smov 0   ;;  %s1360_s17 = smov 0  }
   0x9 LB: > { %s1375_s0 = sadd.s32 4294967295, %s1322_s17   ;;  %s1116_s18 = sadd.s32 4294967294, %s1322_s17   ;;  %s1322_s17 = sphi %s1360_s17, %s2117_s17   ;;  %s1318_s16 = sphi %s1358_s16, %s2116_s16   ;;  %s1314_s15 = sphi %s1356_s15, %s2115_s15   ;;  %s1310_s14 = sphi %s1354_s14, %s2114_s14  }
   0xa   : > { %s1379_s19 = sadd.s32 1, %s1322_s17   ;;  %s51_s20 = sadd.s32 1, %s1318_s16 }
   0xb   : > { %s48_s21 = ssub.s32 %s1322_s17, %s1379_s19  ;;  %p58_p0 = scmp.ne.s32.totalorder %s1318_s16, %s1314_s15 }
   0xc   : > { %p49_p1 = scmp.eq.s32.totalorder %s48_s21, 0  ;;  %p59_p2 = scmp.eq.s32.totalorder %s1322_s17, 0 }
   0xd   : > { %p64_p3 = scmp.ne.s32.totalorder %s1314_s15, %s1310_s14  ;;  %p65_p4 = scmp.eq.s32.totalorder %s1375_s0, 0 }
   0xe   : > { %s1391_s22 = scalar_select %p49_p1, %s1318_s16, %s51_s20  }
   0xf   : > { %p1393_p5 = por %p59_p2, %p58_p0  ;;  %p1397_p6 = por %p65_p4, %p64_p3 }
  0x10   : > { %p114_p7 = scmp.eq.s32.totalorder %s1375_s0, 1  ;;  %p120_p8 = scmp.eq.s32.totalorder %s1116_s18, 1 }
  0x11   : > { %s2105_s24 = scalar_select %p1397_p6, 1, 0 }
  0x12   : > { %p1160_p10 = scmp.lt.s32.totalorder %s1322_s17, 2  ;;  %p1404_p11 = por %p114_p7, %p58_p0 }
  0x13   : > { %p1408_p12 = por %p120_p8, %p64_p3  ;;  %s1413_s27 = sand.u32 1, %s1318_s16  }
  0x14   : > { %s2106_s25 = scalar_select %p1404_p11, 1, 0 }
  0x15   : > { %s2107_s26 = scalar_select %p1408_p12, 1, 0 }
  0x16   : > { %s1138_s28 = sshll.u32 %s1322_s17, 14  ;;  %s1119_s29 = sshll.u32 %s1413_s27, 10 }
  0x17   : > { %s1422_s5 = scalar_lea.hbm %s2099_s1, %s1138_s28  ;;  %s147_s6 = scalar_lea.vmem [#allocation3], %s1119_s29 }
  0x18   : > { %s155_s7 = sshll.u32 %s147_s6, 4  ;;  %p1428_p13 = pnand %p1160_p10, %p1393_p5  ;;  %s1432_s7 = int_to_ptr.vmem [resolvable:$true] %s155_s7 }
  0x19   : > { %s144_s9 = scalar_lea.sflag [#allocation4], %s1413_s27  ;;  %s1198_s10 = scalar_lea.hbm %s1422_s5, 16384 }
  0x1a   : > { %p1199_p0 = scmp.ne.s32.totalorder %s1422_s5, %s1198_s10  ;;  %p1200_p1 = pneg %p1428_p13 }
  0x1b   : > { %s1203_s13 = scalar_lea.hbm %s2099_s1, 32768  ;;  %p1204_p4 = scmp.lt.s32.totalorder %s1422_s5, %s2099_s1 }
  0x1c   : > { %p1201_p2 = pnand %p1200_p1, %p1199_p0  ;;  %p1205_p5 = scmp.lt.s32.totalorder %s1203_s13, %s1198_s10 }
  0x1e   : > { %p1202_p3 = pneg %p1201_p2  ;;  %p1206_p7 = por %p1205_p5, %p1204_p4 }
  0x20   : > { %p1207_p8 = pnand %p1206_p7, %p1202_p3 }
  0x22   : > { %1210 = shalt.err (!%p1207_p8)
}
  0x23   : > { %s1211_s21 = scalar_lea.vmem %s1432_s7, 16384  ;;  %s1324_s23 = smov [#allocation3]  }
  0x24   : > { %p1212_p10 = scmp.ne.s32.totalorder %s1432_s7, %s1211_s21  ;;  %s1216_s30 = sshll.u32 %s1324_s23, 4  ;;  %s1217_s30 = int_to_ptr.vmem [resolvable:$false] %s1216_s30 }
  0x25   : > { %s1218_s4 = scalar_lea.vmem %s1217_s30, 32768  ;;  %p1219_p9 = scmp.lt.s32.totalorder %s1432_s7, %s1217_s30 }
  0x26   : > { %p1214_p0 = pnand %p1212_p10, %p1200_p1  ;;  %p1220_p12 = scmp.lt.s32.totalorder %s1218_s4, %s1211_s21 }
  0x28   : > { %p1215_p2 = pneg %p1214_p0  ;;  %p1221_p11 = por %p1220_p12, %p1219_p9 }
  0x2a   : > { %p1222_p4 = pnand %p1221_p11, %p1215_p2 }
  0x2c   : > { %1225 = shalt.err (!%p1222_p4)
}
  0x2d   : > { %s1325_s6 = smov 1024   ;;  %s1326_s10 = smov 64  }
  0x2e   : > { %1152 = dma.hbm_to_vmem [thread:$0]  (!%p1428_p13), %s1422_s5, 16384, %s1432_s7, %s144_s9, %s1325_s6, %s1325_s6, %s1326_s10  }
  0x2f   : > { %p1127_p9 = scmp.ge.s32.totalorder %s1322_s17, 1  ;;  %p185_p11 = scmp.lt.s32.totalorder %s1322_s17, 3 }
  0x30   : > { %s1475_s18 = scalar_lea.hbm %s2100_s2, %s1138_s28  ;;  %s169_s20 = scalar_lea.vmem [#allocation6], %s1119_s29 }
  0x31   : > { %p1466_p12 = pnand %p1127_p9, %p185_p11  ;;  %s177_s21 = sshll.u32 %s169_s20, 4  ;;  %s1479_s21 = int_to_ptr.vmem [resolvable:$true] %s177_s21 }
  0x32   : > { %s166_s5 = scalar_lea.sflag [#allocation7], %s1413_s27  ;;  %s1226_s7 = scalar_lea.hbm %s1475_s18, 16384 }
  0x33   : > { %p1227_p3 = scmp.ne.s32.totalorder %s1475_s18, %s1226_s7  ;;  %s1231_s28 = scalar_lea.hbm %s2100_s2, 32768 }
  0x34   : > { %p1232_p8 = scmp.lt.s32.totalorder %s1475_s18, %s2100_s2  ;;  %p1233_p10 = scmp.lt.s32.totalorder %s1231_s28, %s1226_s7 }
  0x35   : > { %p1229_p5 = pnand %p1227_p3, %p1200_p1 }
  0x36   : > { %p1234_p0 = por %p1233_p10, %p1232_p8 }
  0x37   : > { %p1230_p7 = pneg %p1229_p5 }
  0x39   : > { %p1235_p2 = pnand %p1234_p0, %p1230_p7 }
  0x3b   : > { %1238 = shalt.err (!%p1235_p2)
}
  0x3c   : > { %s1239_s27 = scalar_lea.vmem %s1479_s21, 16384  ;;  %s1327_s29 = smov [#allocation6]  }
  0x3d   : > { %p1240_p4 = scmp.ne.s32.totalorder %s1479_s21, %s1239_s27  ;;  %s1244_s12 = sshll.u32 %s1327_s29, 4  ;;  %s1245_s12 = int_to_ptr.vmem [resolvable:$false] %s1244_s12 }
  0x3e   : > { %s1246_s13 = scalar_lea.vmem %s1245_s12, 32768  ;;  %p1247_p3 = scmp.lt.s32.totalorder %s1479_s21, %s1245_s12 }
  0x3f   : > { %p1242_p9 = pnand %p1240_p4, %p1200_p1  ;;  %p1248_p5 = scmp.lt.s32.totalorder %s1246_s13, %s1239_s27 }
  0x41   : > { %p1243_p11 = pneg %p1242_p9  ;;  %p1249_p6 = por %p1248_p5, %p1247_p3 }
  0x43   : > { %p1250_p8 = pnand %p1249_p6, %p1243_p11 }
  0x45   : > { %1253 = shalt.err (!%p1250_p8)
}
  0x46   : > { %1155 = dma.hbm_to_vmem [thread:$0]  (!%p1428_p13), %s1475_s18, 16384, %s1479_s21, %s166_s5, %s1325_s6, %s1325_s6, %s1326_s10  }
  0x47   : > { %189 = sbr.rel (%p1466_p12) target bundleno = 205 (0xcd), region = 32  ;;  %s1510_s20 = sand.u32 (!%p1466_p12), 1, %s1314_s15  }
  0x48   : > { %s1513_s7 = sshll.u32 (!%p1466_p12), %s1510_s20, 10  ;;  %s192_s9 = scalar_lea.sflag (!%p1466_p12), [#allocation4], %s1510_s20 }
  0x49   : > { %s1517_s8 = scalar_lea.vmem (!%p1466_p12), [#allocation3], %s1513_s7  ;;  %p2110_p6 = scmp.ne.s32.totalorder (!%p1466_p12), %s2105_s24, 0 }
  0x4c   : > { %1297 = dma.done.wait (%p2110_p6), %s192_s9, 16384  }
  0x4d   : > { %1299 = vsyncadd (%p2110_p6), %s192_s9, 4294950912  ;;  %s201_s6 = scalar_lea.sflag [#allocation7], %s1510_s20  ;;  %s1525_s10 = scalar_lea.vmem [#allocation6], %s1513_s7 }
  0x4e   : > { %1301 = dma.done.wait (%p2110_p6), %s201_s6, 16384  }
  0x4f   : > { %1303 = vsyncadd (%p2110_p6), %s201_s6, 4294950912  ;;  %s235_s11 = sld [smem:[#allocation2]]  ;;  %v236_v0 = vld [vmem:[%s1517_s8] sm:$0xff]  ;;  %v237_v3 = vld [vmem:[%s1517_s8 + $0x8] sm:$0xff]  ;;  %s1561_s24 = scalar_lea.vmem [#allocation8], %s1513_s7 }
  0x50   : > { %v364_v1 = vld [vmem:[%s1525_s10] sm:$0xff]  ;;  %v365_v5 = vld [vmem:[%s1525_s10 + $0x8] sm:$0xff]  ;;  %v238_v6 = vld [vmem:[%s1517_s8 + $0x10] sm:$0xff]  ;;  %s1142_s18 = sshll.u32 %s1375_s0, 14  ;;  %s1020_s21 = sshll.u32 %s1561_s24, 4  ;;  %s2053_s21 = int_to_ptr.vmem [resolvable:$true] %s1020_s21 }
  0x51   : > { %v492_v4 = vsub.f32 %v364_v1, %v236_v0  ;;  %v366_v7 = vld [vmem:[%s1525_s10 + $0x10] sm:$0xff]  ;;  %v493_v8 = vsub.f32 %v365_v5, %v237_v3  ;;  %v239_v10 = vld [vmem:[%s1517_s8 + $0x18] sm:$0xff]  ;;  %v240_v12 = vld [vmem:[%s1517_s8 + $0x20] sm:$0xff]  ;;  %s2051_s28 = scalar_lea.hbm %s2101_s3, %s1142_s18  ;;  %s1006_s0 = scalar_lea.sflag [#allocation5], %s1510_s20 }
  0x52   : > { %v494_v9 = vsub.f32 %v366_v7, %v238_v6  ;;  %v367_v11 = vld [vmem:[%s1525_s10 + $0x18] sm:$0xff]  ;;  %v368_v15 = vld [vmem:[%s1525_s10 + $0x20] sm:$0xff]  ;;  %v241_v16 = vld [vmem:[%s1517_s8 + $0x28] sm:$0xff]  ;;  %s1254_s30 = scalar_lea.vmem %s2053_s21, 16384  ;;  %p2111_p1 = scmp.ne.s32.totalorder %s2106_s25, 0 }
  0x53   : > { %v495_v14 = vsub.f32 %v367_v11, %v239_v10  ;;  %v369_v17 = vld [vmem:[%s1525_s10 + $0x28] sm:$0xff]  ;;  %v496_v20 = vsub.f32 %v368_v15, %v240_v12  ;;  %v242_v22 = vld [vmem:[%s1517_s8 + $0x30] sm:$0xff]  ;;  %v243_v24 = vld [vmem:[%s1517_s8 + $0x38] sm:$0xff]  ;;  %p1255_p13 = scmp.ne.s32.totalorder %s2053_s21, %s1254_s30  ;;  %s1328_s4 = smov [#allocation8]  }
  0x54   : > { %v497_v21 = vsub.f32 %v369_v17, %v241_v16  ;;  %v370_v23 = vld [vmem:[%s1525_s10 + $0x30] sm:$0xff]  ;;  %v371_v28 = vld [vmem:[%s1525_s10 + $0x38] sm:$0xff]  ;;  %v244_v29 = vld [vmem:[%s1517_s8 + $0x40] sm:$0xff]  ;;  %s1258_s27 = sshll.u32 %s1328_s4, 4  ;;  %s1259_s27 = int_to_ptr.vmem [resolvable:$false] %s1258_s27 }
  0x55   : > { %v1533_v2 = vstv %s235_s11  ;;  %v498_v27 = vsub.f32 %v370_v23, %v242_v22  ;;  %v372_v30 = vld [vmem:[%s1525_s10 + $0x40] sm:$0xff]  ;;  %v245_v35 = vld [vmem:[%s1517_s8 + $0x48] sm:$0xff]  ;;  %v246_v37 = vld [vmem:[%s1517_s8 + $0x50] sm:$0xff]  ;;  %v499_v40 = vsub.f32 %v371_v28, %v243_v24  ;;  %p1256_p12 = pnand %p1255_p13, %p2111_p1  ;;  %s1260_s29 = scalar_lea.vmem %s1259_s27, 32768 }
  0x56   : > { %v621_v13 = vmul.f32 %v1533_v2, %v492_v4  ;;  %v622_v18 = vmul.f32 %v1533_v2, %v493_v8  ;;  %v623_v19 = vmul.f32 %v1533_v2, %v494_v9  ;;  %v624_v26 = vmul.f32 %v1533_v2, %v495_v14  ;;  %v373_v36 = vld [vmem:[%s1525_s10 + $0x48] sm:$0xff]  ;;  %v374_v42 = vld [vmem:[%s1525_s10 + $0x50] sm:$0xff]  ;;  %v247_v43 = vld [vmem:[%s1517_s8 + $0x58] sm:$0xff]  ;;  %p1261_p10 = scmp.lt.s32.totalorder %s2053_s21, %s1259_s27  ;;  %p1262_p0 = scmp.lt.s32.totalorder %s1260_s29, %s1254_s30 }
  0x57   : > { %v625_v33 = vmul.f32 %v1533_v2, %v496_v20  ;;  %v626_v34 = vmul.f32 %v1533_v2, %v497_v21  ;;  %v627_v39 = vmul.f32 %v1533_v2, %v498_v27  ;;  %v500_v41 = vsub.f32 %v372_v30, %v244_v29  ;;  %v375_v44 = vld [vmem:[%s1525_s10 + $0x58] sm:$0xff]  ;;  %v248_v49 = vld [vmem:[%s1517_s8 + $0x60] sm:$0xff]  ;;  %v249_v51 = vld [vmem:[%s1517_s8 + $0x68] sm:$0xff]  ;;  %p1257_p7 = pneg %p1256_p12 }
  0x58   : > { %v749_v25 = vadd.f32 %v621_v13, %v236_v0  ;;  %v750_v31 = vadd.f32 %v622_v18, %v237_v3  ;;  %v751_v32 = vadd.f32 %v623_v19, %v238_v6  ;;  %v752_v38 = vadd.f32 %v624_v26, %v239_v10  ;;  %v376_v50 = vld [vmem:[%s1525_s10 + $0x60] sm:$0xff]  ;;  %v377_v56 = vld [vmem:[%s1525_s10 + $0x68] sm:$0xff]  ;;  %v250_v57 = vld [vmem:[%s1517_s8 + $0x70] sm:$0xff]  ;;  %p1263_p2 = por %p1262_p0, %p1261_p10 }
  0x59   : > { %v753_v45 = vadd.f32 %v625_v33, %v240_v12  ;;  %v754_v46 = vadd.f32 %v626_v34, %v241_v16  ;;  %v501_v47 = vsub.f32 %v373_v36, %v245_v35  ;;  %v502_v48 = vsub.f32 %v374_v42, %v246_v37  ;;  %v378_v58 = vld [vmem:[%s1525_s10 + $0x70] sm:$0xff]  ;;  %v251_v63 = vld [vmem:[%s1517_s8 + $0x78] sm:$0xff]  ;;  %v252_v1 = vld [vmem:[%s1517_s8 + $0x80] sm:$0xff] }
  0x5a   : > { %877 = vst [vmem:[%s1561_s24] sm:$0xff] %v749_v25  ;;  %878 = vst [vmem:[%s1561_s24 + $0x8] sm:$0xff] %v750_v31  ;;  %v755_v52 = vadd.f32 %v627_v39, %v242_v22  ;;  %v628_v53 = vmul.f32 %v1533_v2, %v499_v40  ;;  %v629_v54 = vmul.f32 %v1533_v2, %v500_v41  ;;  %v379_v0 = vld [vmem:[%s1525_s10 + $0x78] sm:$0xff]  ;;  %v380_v7 = vld [vmem:[%s1525_s10 + $0x80] sm:$0xff]  ;;  %p1264_p4 = pnand %p1263_p2, %p1257_p7 }
  0x5b   : > { %879 = vst [vmem:[%s1561_s24 + $0x10] sm:$0xff] %v751_v32  ;;  %880 = vst [vmem:[%s1561_s24 + $0x18] sm:$0xff] %v752_v38  ;;  %v503_v55 = vsub.f32 %v375_v44, %v247_v43  ;;  %v630_v59 = vmul.f32 %v1533_v2, %v501_v47  ;;  %v631_v60 = vmul.f32 %v1533_v2, %v502_v48  ;;  %v253_v8 = vld [vmem:[%s1517_s8 + $0x88] sm:$0xff]  ;;  %v254_v14 = vld [vmem:[%s1517_s8 + $0x90] sm:$0xff] }
  0x5c   : > { %881 = vst [vmem:[%s1561_s24 + $0x20] sm:$0xff] %v753_v45  ;;  %882 = vst [vmem:[%s1561_s24 + $0x28] sm:$0xff] %v754_v46  ;;  %v504_v61 = vsub.f32 %v376_v50, %v248_v49  ;;  %v505_v62 = vsub.f32 %v377_v56, %v249_v51  ;;  %v756_v3 = vadd.f32 %v628_v53, %v243_v24  ;;  %v381_v9 = vld [vmem:[%s1525_s10 + $0x88] sm:$0xff]  ;;  %v382_v15 = vld [vmem:[%s1525_s10 + $0x90] sm:$0xff] }
  0x5d   : > { %883 = vst [vmem:[%s1561_s24 + $0x30] sm:$0xff] %v755_v52  ;;  %v757_v4 = vadd.f32 %v629_v54, %v244_v29  ;;  %v632_v5 = vmul.f32 %v1533_v2, %v503_v55  ;;  %v506_v6 = vsub.f32 %v378_v58, %v250_v57  ;;  %v758_v10 = vadd.f32 %v630_v59, %v245_v35  ;;  %v255_v16 = vld [vmem:[%s1517_s8 + $0x98] sm:$0xff]  ;;  %v256_v22 = vld [vmem:[%s1517_s8 + $0xa0] sm:$0xff]  ;;  %v257_v28 = vld [vmem:[%s1517_s8 + $0xa8] sm:$0xff] }
  0x5e   : > { %v759_v11 = vadd.f32 %v631_v60, %v246_v37  ;;  %v633_v12 = vmul.f32 %v1533_v2, %v504_v61  ;;  %v634_v13 = vmul.f32 %v1533_v2, %v505_v62  ;;  %884 = vst [vmem:[%s1561_s24 + $0x38] sm:$0xff] %v756_v3  ;;  %v507_v19 = vsub.f32 %v379_v0, %v251_v63  ;;  %v383_v21 = vld [vmem:[%s1525_s10 + $0x98] sm:$0xff]  ;;  %v384_v23 = vld [vmem:[%s1525_s10 + $0xa0] sm:$0xff]  ;;  %v385_v29 = vld [vmem:[%s1525_s10 + $0xa8] sm:$0xff] }
  0x5f   : > { %885 = vst [vmem:[%s1561_s24 + $0x40] sm:$0xff] %v757_v4  ;;  %v760_v17 = vadd.f32 %v632_v5, %v247_v43  ;;  %v635_v18 = vmul.f32 %v1533_v2, %v506_v6  ;;  %v508_v20 = vsub.f32 %v380_v7, %v252_v1  ;;  %886 = vst [vmem:[%s1561_s24 + $0x48] sm:$0xff] %v758_v10  ;;  %v258_v30 = vld [vmem:[%s1517_s8 + $0xb0] sm:$0xff]  ;;  %v259_v36 = vld [vmem:[%s1517_s8 + $0xb8] sm:$0xff] }
  0x60   : > { %887 = vst [vmem:[%s1561_s24 + $0x50] sm:$0xff] %v759_v11  ;;  %v761_v24 = vadd.f32 %v633_v12, %v248_v49  ;;  %v762_v25 = vadd.f32 %v634_v13, %v249_v51  ;;  %v509_v26 = vsub.f32 %v381_v9, %v253_v8  ;;  %v510_v27 = vsub.f32 %v382_v15, %v254_v14  ;;  %v386_v35 = vld [vmem:[%s1525_s10 + $0xb0] sm:$0xff]  ;;  %v387_v37 = vld [vmem:[%s1525_s10 + $0xb8] sm:$0xff]  ;;  %v260_v42 = vld [vmem:[%s1517_s8 + $0xc0] sm:$0xff] }
  0x61   : > { %888 = vst [vmem:[%s1561_s24 + $0x58] sm:$0xff] %v760_v17  ;;  %v763_v31 = vadd.f32 %v635_v18, %v250_v57  ;;  %v636_v32 = vmul.f32 %v1533_v2, %v507_v19  ;;  %v637_v33 = vmul.f32 %v1533_v2, %v508_v20  ;;  %v511_v34 = vsub.f32 %v383_v21, %v255_v16  ;;  %v388_v43 = vld [vmem:[%s1525_s10 + $0xc0] sm:$0xff]  ;;  %v261_v44 = vld [vmem:[%s1517_s8 + $0xc8] sm:$0xff]  ;;  %v262_v50 = vld [vmem:[%s1517_s8 + $0xd0] sm:$0xff] }
  0x62   : > { %889 = vst [vmem:[%s1561_s24 + $0x60] sm:$0xff] %v761_v24  ;;  %890 = vst [vmem:[%s1561_s24 + $0x68] sm:$0xff] %v762_v25  ;;  %v638_v38 = vmul.f32 %v1533_v2, %v509_v26  ;;  %v639_v39 = vmul.f32 %v1533_v2, %v510_v27  ;;  %v512_v40 = vsub.f32 %v384_v23, %v256_v22  ;;  %v389_v49 = vld [vmem:[%s1525_s10 + $0xc8] sm:$0xff]  ;;  %v390_v51 = vld [vmem:[%s1525_s10 + $0xd0] sm:$0xff] }
  0x63   : > { %v513_v41 = vsub.f32 %v385_v29, %v257_v28  ;;  %891 = vst [vmem:[%s1561_s24 + $0x70] sm:$0xff] %v763_v31  ;;  %v764_v45 = vadd.f32 %v636_v32, %v251_v63  ;;  %v765_v46 = vadd.f32 %v637_v33, %v252_v1  ;;  %v640_v47 = vmul.f32 %v1533_v2, %v511_v34  ;;  %v263_v56 = vld [vmem:[%s1517_s8 + $0xd8] sm:$0xff]  ;;  %v264_v58 = vld [vmem:[%s1517_s8 + $0xe0] sm:$0xff]  ;;  %v265_v0 = vld [vmem:[%s1517_s8 + $0xe8] sm:$0xff] }
  0x64   : > { %v514_v48 = vsub.f32 %v386_v35, %v258_v30  ;;  %v766_v52 = vadd.f32 %v638_v38, %v253_v8  ;;  %v767_v53 = vadd.f32 %v639_v39, %v254_v14  ;;  %v641_v54 = vmul.f32 %v1533_v2, %v512_v40  ;;  %v391_v57 = vld [vmem:[%s1525_s10 + $0xd8] sm:$0xff]  ;;  %v392_v63 = vld [vmem:[%s1525_s10 + $0xe0] sm:$0xff]  ;;  %v393_v1 = vld [vmem:[%s1525_s10 + $0xe8] sm:$0xff] }
  0x65   : > { %v642_v55 = vmul.f32 %v1533_v2, %v513_v41  ;;  %892 = vst [vmem:[%s1561_s24 + $0x78] sm:$0xff] %v764_v45  ;;  %893 = vst [vmem:[%s1561_s24 + $0x80] sm:$0xff] %v765_v46  ;;  %v768_v59 = vadd.f32 %v640_v47, %v255_v16  ;;  %v515_v61 = vsub.f32 %v387_v37, %v259_v36  ;;  %v266_v7 = vld [vmem:[%s1517_s8 + $0xf0] sm:$0xff]  ;;  %v267_v13 = vld [vmem:[%s1517_s8 + $0xf8] sm:$0xff] }
  0x66   : > { %v643_v60 = vmul.f32 %v1533_v2, %v514_v48  ;;  %v516_v62 = vsub.f32 %v388_v43, %v260_v42  ;;  %894 = vst [vmem:[%s1561_s24 + $0x88] sm:$0xff] %v766_v52  ;;  %895 = vst [vmem:[%s1561_s24 + $0x90] sm:$0xff] %v767_v53  ;;  %v769_v3 = vadd.f32 %v641_v54, %v256_v22  ;;  %v394_v8 = vld [vmem:[%s1525_s10 + $0xf0] sm:$0xff]  ;;  %v395_v14 = vld [vmem:[%s1525_s10 + $0xf8] sm:$0xff] }
  0x67   : > { %v770_v4 = vadd.f32 %v642_v55, %v257_v28  ;;  %v517_v5 = vsub.f32 %v389_v49, %v261_v44  ;;  %v518_v6 = vsub.f32 %v390_v51, %v262_v50  ;;  %896 = vst [vmem:[%s1561_s24 + $0x98] sm:$0xff] %v768_v59  ;;  %v644_v10 = vmul.f32 %v1533_v2, %v515_v61  ;;  %v268_v19 = vld [vmem:[%s1517_s8 + $0x100] sm:$0xff]  ;;  %v269_v21 = vld [vmem:[%s1517_s8 + $0x108] sm:$0xff]  ;;  %v270_v27 = vld [vmem:[%s1517_s8 + $0x110] sm:$0xff] }
  0x68   : > { %v771_v9 = vadd.f32 %v643_v60, %v258_v30  ;;  %v645_v11 = vmul.f32 %v1533_v2, %v516_v62  ;;  %v519_v12 = vsub.f32 %v391_v57, %v263_v56  ;;  %897 = vst [vmem:[%s1561_s24 + $0xa0] sm:$0xff] %v769_v3  ;;  %v520_v17 = vsub.f32 %v392_v63, %v264_v58  ;;  %v396_v20 = vld [vmem:[%s1525_s10 + $0x100] sm:$0xff]  ;;  %v397_v26 = vld [vmem:[%s1525_s10 + $0x108] sm:$0xff]  ;;  %v398_v28 = vld [vmem:[%s1525_s10 + $0x110] sm:$0xff] }
  0x69   : > { %898 = vst [vmem:[%s1561_s24 + $0xa8] sm:$0xff] %v770_v4  ;;  %v646_v15 = vmul.f32 %v1533_v2, %v517_v5  ;;  %v647_v16 = vmul.f32 %v1533_v2, %v518_v6  ;;  %v521_v18 = vsub.f32 %v393_v1, %v265_v0  ;;  %v772_v22 = vadd.f32 %v644_v10, %v259_v36  ;;  %v271_v33 = vld [vmem:[%s1517_s8 + $0x118] sm:$0xff]  ;;  %v272_v35 = vld [vmem:[%s1517_s8 + $0x120] sm:$0xff]  ;;  %v273_v41 = vld [vmem:[%s1517_s8 + $0x128] sm:$0xff] }
  0x6a   : > { %899 = vst [vmem:[%s1561_s24 + $0xb0] sm:$0xff] %v771_v9  ;;  %v773_v23 = vadd.f32 %v645_v11, %v260_v42  ;;  %v648_v24 = vmul.f32 %v1533_v2, %v519_v12  ;;  %v522_v25 = vsub.f32 %v394_v8, %v266_v7  ;;  %v649_v31 = vmul.f32 %v1533_v2, %v520_v17  ;;  %v399_v34 = vld [vmem:[%s1525_s10 + $0x118] sm:$0xff]  ;;  %v400_v40 = vld [vmem:[%s1525_s10 + $0x120] sm:$0xff]  ;;  %v401_v42 = vld [vmem:[%s1525_s10 + $0x128] sm:$0xff] }
  0x6b   : > { %v774_v29 = vadd.f32 %v646_v15, %v261_v44  ;;  %v775_v30 = vadd.f32 %v647_v16, %v262_v50  ;;  %v650_v32 = vmul.f32 %v1533_v2, %v521_v18  ;;  %900 = vst [vmem:[%s1561_s24 + $0xb8] sm:$0xff] %v772_v22  ;;  %v523_v38 = vsub.f32 %v395_v14, %v267_v13  ;;  %v274_v47 = vld [vmem:[%s1517_s8 + $0x130] sm:$0xff]  ;;  %v275_v53 = vld [vmem:[%s1517_s8 + $0x138] sm:$0xff]  ;;  %v276_v59 = vld [vmem:[%s1517_s8 + $0x140] sm:$0xff] }
  0x6c   : > { %901 = vst [vmem:[%s1561_s24 + $0xc0] sm:$0xff] %v773_v23  ;;  %v776_v36 = vadd.f32 %v648_v24, %v263_v56  ;;  %v651_v37 = vmul.f32 %v1533_v2, %v522_v25  ;;  %v524_v39 = vsub.f32 %v396_v20, %v268_v19  ;;  %v777_v43 = vadd.f32 %v649_v31, %v264_v58  ;;  %v402_v48 = vld [vmem:[%s1525_s10 + $0x130] sm:$0xff]  ;;  %v403_v54 = vld [vmem:[%s1525_s10 + $0x138] sm:$0xff]  ;;  %v404_v60 = vld [vmem:[%s1525_s10 + $0x140] sm:$0xff] }
  0x6d   : > { %902 = vst [vmem:[%s1561_s24 + $0xc8] sm:$0xff] %v774_v29  ;;  %903 = vst [vmem:[%s1561_s24 + $0xd0] sm:$0xff] %v775_v30  ;;  %v778_v44 = vadd.f32 %v650_v32, %v265_v0  ;;  %v525_v45 = vsub.f32 %v397_v26, %v269_v21  ;;  %v526_v46 = vsub.f32 %v398_v28, %v270_v27  ;;  %v277_v61 = vld [vmem:[%s1517_s8 + $0x148] sm:$0xff]  ;;  %v278_v4 = vld [vmem:[%s1517_s8 + $0x150] sm:$0xff] }
  0x6e   : > { %904 = vst [vmem:[%s1561_s24 + $0xd8] sm:$0xff] %v776_v36  ;;  %v779_v49 = vadd.f32 %v651_v37, %v266_v7  ;;  %v652_v50 = vmul.f32 %v1533_v2, %v523_v38  ;;  %v653_v51 = vmul.f32 %v1533_v2, %v524_v39  ;;  %v527_v52 = vsub.f32 %v399_v34, %v271_v33  ;;  %v405_v3 = vld [vmem:[%s1525_s10 + $0x148] sm:$0xff]  ;;  %v406_v5 = vld [vmem:[%s1525_s10 + $0x150] sm:$0xff]  ;;  %v279_v10 = vld [vmem:[%s1517_s8 + $0x158] sm:$0xff] }
  0x6f   : > { %905 = vst [vmem:[%s1561_s24 + $0xe0] sm:$0xff] %v777_v43  ;;  %906 = vst [vmem:[%s1561_s24 + $0xe8] sm:$0xff] %v778_v44  ;;  %v654_v55 = vmul.f32 %v1533_v2, %v525_v45  ;;  %v655_v56 = vmul.f32 %v1533_v2, %v526_v46  ;;  %v528_v57 = vsub.f32 %v400_v40, %v272_v35  ;;  %v407_v11 = vld [vmem:[%s1525_s10 + $0x158] sm:$0xff]  ;;  %v280_v12 = vld [vmem:[%s1517_s8 + $0x160] sm:$0xff] }
  0x70   : > { %v529_v58 = vsub.f32 %v401_v42, %v273_v41  ;;  %907 = vst [vmem:[%s1561_s24 + $0xf0] sm:$0xff] %v779_v49  ;;  %v780_v62 = vadd.f32 %v652_v50, %v267_v13  ;;  %v781_v63 = vadd.f32 %v653_v51, %v268_v19  ;;  %v656_v0 = vmul.f32 %v1533_v2, %v527_v52  ;;  %v408_v17 = vld [vmem:[%s1525_s10 + $0x160] sm:$0xff]  ;;  %v281_v18 = vld [vmem:[%s1517_s8 + $0x168] sm:$0xff]  ;;  %v282_v24 = vld [vmem:[%s1517_s8 + $0x170] sm:$0xff] }
  0x71   : > { %v530_v1 = vsub.f32 %v402_v48, %v274_v47  ;;  %v782_v6 = vadd.f32 %v654_v55, %v269_v21  ;;  %v783_v7 = vadd.f32 %v655_v56, %v270_v27  ;;  %v657_v8 = vmul.f32 %v1533_v2, %v528_v57  ;;  %v409_v19 = vld [vmem:[%s1525_s10 + $0x168] sm:$0xff]  ;;  %v410_v25 = vld [vmem:[%s1525_s10 + $0x170] sm:$0xff]  ;;  %v283_v30 = vld [vmem:[%s1517_s8 + $0x178] sm:$0xff] }
  0x72   : > { %v658_v9 = vmul.f32 %v1533_v2, %v529_v58  ;;  %908 = vst [vmem:[%s1561_s24 + $0xf8] sm:$0xff] %v780_v62  ;;  %909 = vst [vmem:[%s1561_s24 + $0x100] sm:$0xff] %v781_v63  ;;  %v784_v13 = vadd.f32 %v656_v0, %v271_v33  ;;  %v531_v15 = vsub.f32 %v403_v54, %v275_v53  ;;  %v411_v31 = vld [vmem:[%s1525_s10 + $0x178] sm:$0xff]  ;;  %v284_v36 = vld [vmem:[%s1517_s8 + $0x180] sm:$0xff] }
  0x73   : > { %v659_v14 = vmul.f32 %v1533_v2, %v530_v1  ;;  %v532_v16 = vsub.f32 %v404_v60, %v276_v59  ;;  %910 = vst [vmem:[%s1561_s24 + $0x108] sm:$0xff] %v782_v6  ;;  %911 = vst [vmem:[%s1561_s24 + $0x110] sm:$0xff] %v783_v7  ;;  %v785_v20 = vadd.f32 %v657_v8, %v272_v35  ;;  %v412_v37 = vld [vmem:[%s1525_s10 + $0x180] sm:$0xff]  ;;  %v285_v38 = vld [vmem:[%s1517_s8 + $0x188] sm:$0xff] }
  0x74   : > { %v786_v21 = vadd.f32 %v658_v9, %v273_v41  ;;  %v533_v22 = vsub.f32 %v405_v3, %v277_v61  ;;  %v534_v23 = vsub.f32 %v406_v5, %v278_v4  ;;  %912 = vst [vmem:[%s1561_s24 + $0x118] sm:$0xff] %v784_v13  ;;  %v660_v27 = vmul.f32 %v1533_v2, %v531_v15  ;;  %v413_v43 = vld [vmem:[%s1525_s10 + $0x188] sm:$0xff]  ;;  %v286_v44 = vld [vmem:[%s1517_s8 + $0x190] sm:$0xff]  ;;  %v287_v50 = vld [vmem:[%s1517_s8 + $0x198] sm:$0xff] }
  0x75   : > { %v787_v26 = vadd.f32 %v659_v14, %v274_v47  ;;  %v661_v28 = vmul.f32 %v1533_v2, %v532_v16  ;;  %v535_v29 = vsub.f32 %v407_v11, %v279_v10  ;;  %913 = vst [vmem:[%s1561_s24 + $0x120] sm:$0xff] %v785_v20  ;;  %v536_v34 = vsub.f32 %v408_v17, %v280_v12  ;;  %v414_v45 = vld [vmem:[%s1525_s10 + $0x190] sm:$0xff]  ;;  %v415_v51 = vld [vmem:[%s1525_s10 + $0x198] sm:$0xff]  ;;  %v288_v52 = vld [vmem:[%s1517_s8 + $0x1a0] sm:$0xff] }
  0x76   : > { %914 = vst [vmem:[%s1561_s24 + $0x128] sm:$0xff] %v786_v21  ;;  %v662_v32 = vmul.f32 %v1533_v2, %v533_v22  ;;  %v663_v33 = vmul.f32 %v1533_v2, %v534_v23  ;;  %v537_v35 = vsub.f32 %v409_v19, %v281_v18  ;;  %v788_v39 = vadd.f32 %v660_v27, %v275_v53  ;;  %v416_v57 = vld [vmem:[%s1525_s10 + $0x1a0] sm:$0xff]  ;;  %v289_v58 = vld [vmem:[%s1517_s8 + $0x1a8] sm:$0xff]  ;;  %v290_v0 = vld [vmem:[%s1517_s8 + $0x1b0] sm:$0xff] }
  0x77   : > { %915 = vst [vmem:[%s1561_s24 + $0x130] sm:$0xff] %v787_v26  ;;  %v789_v40 = vadd.f32 %v661_v28, %v276_v59  ;;  %v664_v41 = vmul.f32 %v1533_v2, %v535_v29  ;;  %v538_v42 = vsub.f32 %v410_v25, %v282_v24  ;;  %v665_v48 = vmul.f32 %v1533_v2, %v536_v34  ;;  %v417_v59 = vld [vmem:[%s1525_s10 + $0x1a8] sm:$0xff]  ;;  %v418_v1 = vld [vmem:[%s1525_s10 + $0x1b0] sm:$0xff]  ;;  %v291_v7 = vld [vmem:[%s1517_s8 + $0x1b8] sm:$0xff] }
  0x78   : > { %v790_v46 = vadd.f32 %v662_v32, %v277_v61  ;;  %v791_v47 = vadd.f32 %v663_v33, %v278_v4  ;;  %v666_v49 = vmul.f32 %v1533_v2, %v537_v35  ;;  %916 = vst [vmem:[%s1561_s24 + $0x138] sm:$0xff] %v788_v39  ;;  %v539_v55 = vsub.f32 %v411_v31, %v283_v30  ;;  %v419_v8 = vld [vmem:[%s1525_s10 + $0x1b8] sm:$0xff]  ;;  %v292_v13 = vld [vmem:[%s1517_s8 + $0x1c0] sm:$0xff]  ;;  %v293_v15 = vld [vmem:[%s1517_s8 + $0x1c8] sm:$0xff] }
  0x79   : > { %917 = vst [vmem:[%s1561_s24 + $0x140] sm:$0xff] %v789_v40  ;;  %v792_v53 = vadd.f32 %v664_v41, %v279_v10  ;;  %v667_v54 = vmul.f32 %v1533_v2, %v538_v42  ;;  %v540_v56 = vsub.f32 %v412_v37, %v284_v36  ;;  %v793_v60 = vadd.f32 %v665_v48, %v280_v12  ;;  %v420_v14 = vld [vmem:[%s1525_s10 + $0x1c0] sm:$0xff]  ;;  %v421_v20 = vld [vmem:[%s1525_s10 + $0x1c8] sm:$0xff]  ;;  %v294_v21 = vld [vmem:[%s1517_s8 + $0x1d0] sm:$0xff] }
  0x7a   : > { %918 = vst [vmem:[%s1561_s24 + $0x148] sm:$0xff] %v790_v46  ;;  %919 = vst [vmem:[%s1561_s24 + $0x150] sm:$0xff] %v791_v47  ;;  %v794_v61 = vadd.f32 %v666_v49, %v281_v18  ;;  %v541_v62 = vsub.f32 %v413_v43, %v285_v38  ;;  %v542_v63 = vsub.f32 %v414_v45, %v286_v44  ;;  %v422_v22 = vld [vmem:[%s1525_s10 + $0x1d0] sm:$0xff]  ;;  %v295_v27 = vld [vmem:[%s1517_s8 + $0x1d8] sm:$0xff] }
  0x7b   : > { %920 = vst [vmem:[%s1561_s24 + $0x158] sm:$0xff] %v792_v53  ;;  %v795_v3 = vadd.f32 %v667_v54, %v282_v24  ;;  %v668_v4 = vmul.f32 %v1533_v2, %v539_v55  ;;  %v669_v5 = vmul.f32 %v1533_v2, %v540_v56  ;;  %v543_v6 = vsub.f32 %v415_v51, %v287_v50  ;;  %v423_v28 = vld [vmem:[%s1525_s10 + $0x1d8] sm:$0xff]  ;;  %v296_v29 = vld [vmem:[%s1517_s8 + $0x1e0] sm:$0xff]  ;;  %v297_v35 = vld [vmem:[%s1517_s8 + $0x1e8] sm:$0xff] }
  0x7c   : > { %921 = vst [vmem:[%s1561_s24 + $0x160] sm:$0xff] %v793_v60  ;;  %922 = vst [vmem:[%s1561_s24 + $0x168] sm:$0xff] %v794_v61  ;;  %v670_v9 = vmul.f32 %v1533_v2, %v541_v62  ;;  %v671_v10 = vmul.f32 %v1533_v2, %v542_v63  ;;  %v544_v11 = vsub.f32 %v416_v57, %v288_v52  ;;  %v424_v34 = vld [vmem:[%s1525_s10 + $0x1e0] sm:$0xff]  ;;  %v298_v41 = vld [vmem:[%s1517_s8 + $0x1f0] sm:$0xff] }
  0x7d   : > { %v545_v12 = vsub.f32 %v417_v59, %v289_v58  ;;  %923 = vst [vmem:[%s1561_s24 + $0x170] sm:$0xff] %v795_v3  ;;  %v796_v16 = vadd.f32 %v668_v4, %v283_v30  ;;  %v797_v17 = vadd.f32 %v669_v5, %v284_v36  ;;  %v672_v18 = vmul.f32 %v1533_v2, %v543_v6  ;;  %v425_v36 = vld [vmem:[%s1525_s10 + $0x1e8] sm:$0xff]  ;;  %v426_v42 = vld [vmem:[%s1525_s10 + $0x1f0] sm:$0xff]  ;;  %v299_v47 = vld [vmem:[%s1517_s8 + $0x1f8] sm:$0xff] }
  0x7e   : > { %v546_v19 = vsub.f32 %v418_v1, %v290_v0  ;;  %v798_v23 = vadd.f32 %v670_v9, %v285_v38  ;;  %v799_v24 = vadd.f32 %v671_v10, %v286_v44  ;;  %v673_v25 = vmul.f32 %v1533_v2, %v544_v11  ;;  %v427_v48 = vld [vmem:[%s1525_s10 + $0x1f8] sm:$0xff]  ;;  %v300_v53 = vld [vmem:[%s1517_s8 + $0x200] sm:$0xff]  ;;  %v301_v55 = vld [vmem:[%s1517_s8 + $0x208] sm:$0xff] }
  0x7f   : > { %v674_v26 = vmul.f32 %v1533_v2, %v545_v12  ;;  %924 = vst [vmem:[%s1561_s24 + $0x178] sm:$0xff] %v796_v16  ;;  %925 = vst [vmem:[%s1561_s24 + $0x180] sm:$0xff] %v797_v17  ;;  %v800_v30 = vadd.f32 %v672_v18, %v287_v50  ;;  %v547_v32 = vsub.f32 %v419_v8, %v291_v7  ;;  %v428_v54 = vld [vmem:[%s1525_s10 + $0x200] sm:$0xff]  ;;  %v429_v60 = vld [vmem:[%s1525_s10 + $0x208] sm:$0xff] }
  0x80   : > { %v675_v31 = vmul.f32 %v1533_v2, %v546_v19  ;;  %v548_v33 = vsub.f32 %v420_v14, %v292_v13  ;;  %926 = vst [vmem:[%s1561_s24 + $0x188] sm:$0xff] %v798_v23  ;;  %927 = vst [vmem:[%s1561_s24 + $0x190] sm:$0xff] %v799_v24  ;;  %v801_v37 = vadd.f32 %v673_v25, %v288_v52  ;;  %v302_v61 = vld [vmem:[%s1517_s8 + $0x210] sm:$0xff]  ;;  %v303_v4 = vld [vmem:[%s1517_s8 + $0x218] sm:$0xff] }
  0x81   : > { %v802_v38 = vadd.f32 %v674_v26, %v289_v58  ;;  %v549_v39 = vsub.f32 %v421_v20, %v293_v15  ;;  %v550_v40 = vsub.f32 %v422_v22, %v294_v21  ;;  %928 = vst [vmem:[%s1561_s24 + $0x198] sm:$0xff] %v800_v30  ;;  %v676_v44 = vmul.f32 %v1533_v2, %v547_v32  ;;  %v430_v62 = vld [vmem:[%s1525_s10 + $0x210] sm:$0xff]  ;;  %v431_v5 = vld [vmem:[%s1525_s10 + $0x218] sm:$0xff]  ;;  %v304_v6 = vld [vmem:[%s1517_s8 + $0x220] sm:$0xff] }
  0x82   : > { %v803_v43 = vadd.f32 %v675_v31, %v290_v0  ;;  %v677_v45 = vmul.f32 %v1533_v2, %v548_v33  ;;  %v551_v46 = vsub.f32 %v423_v28, %v295_v27  ;;  %929 = vst [vmem:[%s1561_s24 + $0x1a0] sm:$0xff] %v801_v37  ;;  %v552_v51 = vsub.f32 %v424_v34, %v296_v29  ;;  %v432_v11 = vld [vmem:[%s1525_s10 + $0x220] sm:$0xff]  ;;  %v305_v12 = vld [vmem:[%s1517_s8 + $0x228] sm:$0xff]  ;;  %v306_v18 = vld [vmem:[%s1517_s8 + $0x230] sm:$0xff] }
  0x83   : > { %930 = vst [vmem:[%s1561_s24 + $0x1a8] sm:$0xff] %v802_v38  ;;  %v678_v49 = vmul.f32 %v1533_v2, %v549_v39  ;;  %v679_v50 = vmul.f32 %v1533_v2, %v550_v40  ;;  %v553_v52 = vsub.f32 %v425_v36, %v297_v35  ;;  %v804_v56 = vadd.f32 %v676_v44, %v291_v7  ;;  %v434_v19 = vld [vmem:[%s1525_s10 + $0x230] sm:$0xff]  ;;  %v307_v24 = vld [vmem:[%s1517_s8 + $0x238] sm:$0xff]  ;;  %v308_v30 = vld [vmem:[%s1517_s8 + $0x240] sm:$0xff] }
  0x84   : > { %931 = vst [vmem:[%s1561_s24 + $0x1b0] sm:$0xff] %v803_v43  ;;  %v805_v57 = vadd.f32 %v677_v45, %v292_v13  ;;  %v680_v58 = vmul.f32 %v1533_v2, %v551_v46  ;;  %v554_v59 = vsub.f32 %v426_v42, %v298_v41  ;;  %v681_v1 = vmul.f32 %v1533_v2, %v552_v51  ;;  %v433_v13 = vld [vmem:[%s1525_s10 + $0x228] sm:$0xff]  ;;  %v435_v25 = vld [vmem:[%s1525_s10 + $0x238] sm:$0xff]  ;;  %v436_v31 = vld [vmem:[%s1525_s10 + $0x240] sm:$0xff] }
  0x85   : > { %v806_v63 = vadd.f32 %v678_v49, %v293_v15  ;;  %v807_v0 = vadd.f32 %v679_v50, %v294_v21  ;;  %v682_v3 = vmul.f32 %v1533_v2, %v553_v52  ;;  %932 = vst [vmem:[%s1561_s24 + $0x1b8] sm:$0xff] %v804_v56  ;;  %v555_v9 = vsub.f32 %v427_v48, %v299_v47  ;;  %v309_v32 = vld [vmem:[%s1517_s8 + $0x248] sm:$0xff]  ;;  %v310_v38 = vld [vmem:[%s1517_s8 + $0x250] sm:$0xff]  ;;  %v311_v44 = vld [vmem:[%s1517_s8 + $0x258] sm:$0xff] }
  0x86   : > { %933 = vst [vmem:[%s1561_s24 + $0x1c0] sm:$0xff] %v805_v57  ;;  %v808_v7 = vadd.f32 %v680_v58, %v295_v27  ;;  %v683_v8 = vmul.f32 %v1533_v2, %v554_v59  ;;  %v556_v10 = vsub.f32 %v428_v54, %v300_v53  ;;  %v809_v14 = vadd.f32 %v681_v1, %v296_v29  ;;  %v437_v37 = vld [vmem:[%s1525_s10 + $0x248] sm:$0xff]  ;;  %v438_v39 = vld [vmem:[%s1525_s10 + $0x250] sm:$0xff]  ;;  %v439_v45 = vld [vmem:[%s1525_s10 + $0x258] sm:$0xff] }
  0x87   : > { %934 = vst [vmem:[%s1561_s24 + $0x1c8] sm:$0xff] %v806_v63  ;;  %935 = vst [vmem:[%s1561_s24 + $0x1d0] sm:$0xff] %v807_v0  ;;  %v810_v15 = vadd.f32 %v682_v3, %v297_v35  ;;  %v557_v16 = vsub.f32 %v429_v60, %v301_v55  ;;  %v558_v17 = vsub.f32 %v430_v62, %v302_v61  ;;  %v312_v46 = vld [vmem:[%s1517_s8 + $0x260] sm:$0xff]  ;;  %v313_v52 = vld [vmem:[%s1517_s8 + $0x268] sm:$0xff] }
  0x88   : > { %936 = vst [vmem:[%s1561_s24 + $0x1d8] sm:$0xff] %v808_v7  ;;  %v811_v20 = vadd.f32 %v683_v8, %v298_v41  ;;  %v684_v21 = vmul.f32 %v1533_v2, %v555_v9  ;;  %v685_v22 = vmul.f32 %v1533_v2, %v556_v10  ;;  %v559_v23 = vsub.f32 %v431_v5, %v303_v4  ;;  %v440_v51 = vld [vmem:[%s1525_s10 + $0x260] sm:$0xff]  ;;  %v314_v58 = vld [vmem:[%s1517_s8 + $0x270] sm:$0xff]  ;;  %v315_v0 = vld [vmem:[%s1517_s8 + $0x278] sm:$0xff] }
  0x89   : > { %937 = vst [vmem:[%s1561_s24 + $0x1e0] sm:$0xff] %v809_v14  ;;  %938 = vst [vmem:[%s1561_s24 + $0x1e8] sm:$0xff] %v810_v15  ;;  %v686_v26 = vmul.f32 %v1533_v2, %v557_v16  ;;  %v687_v27 = vmul.f32 %v1533_v2, %v558_v17  ;;  %v560_v28 = vsub.f32 %v432_v11, %v304_v6  ;;  %v442_v59 = vld [vmem:[%s1525_s10 + $0x270] sm:$0xff]  ;;  %v443_v1 = vld [vmem:[%s1525_s10 + $0x278] sm:$0xff] }
  0x8a   : > { %v561_v29 = vsub.f32 %v433_v13, %v305_v12  ;;  %939 = vst [vmem:[%s1561_s24 + $0x1f0] sm:$0xff] %v811_v20  ;;  %v812_v33 = vadd.f32 %v684_v21, %v299_v47  ;;  %v813_v34 = vadd.f32 %v685_v22, %v300_v53  ;;  %v688_v35 = vmul.f32 %v1533_v2, %v559_v23  ;;  %v441_v53 = vld [vmem:[%s1525_s10 + $0x268] sm:$0xff]  ;;  %v316_v7 = vld [vmem:[%s1517_s8 + $0x280] sm:$0xff]  ;;  %v318_v15 = vld [vmem:[%s1517_s8 + $0x290] sm:$0xff] }
  0x8b   : > { %v562_v36 = vsub.f32 %v434_v19, %v306_v18  ;;  %v814_v40 = vadd.f32 %v686_v26, %v301_v55  ;;  %v815_v41 = vadd.f32 %v687_v27, %v302_v61  ;;  %v689_v42 = vmul.f32 %v1533_v2, %v560_v28  ;;  %v444_v8 = vld [vmem:[%s1525_s10 + $0x280] sm:$0xff]  ;;  %v317_v9 = vld [vmem:[%s1517_s8 + $0x288] sm:$0xff]  ;;  %v446_v16 = vld [vmem:[%s1525_s10 + $0x290] sm:$0xff] }
  0x8c   : > { %v690_v43 = vmul.f32 %v1533_v2, %v561_v29  ;;  %940 = vst [vmem:[%s1561_s24 + $0x1f8] sm:$0xff] %v812_v33  ;;  %941 = vst [vmem:[%s1561_s24 + $0x200] sm:$0xff] %v813_v34  ;;  %v816_v47 = vadd.f32 %v688_v35, %v303_v4  ;;  %v563_v49 = vsub.f32 %v435_v25, %v307_v24  ;;  %v445_v14 = vld [vmem:[%s1525_s10 + $0x288] sm:$0xff]  ;;  %v319_v21 = vld [vmem:[%s1517_s8 + $0x298] sm:$0xff] }
  0x8d   : > { %v691_v48 = vmul.f32 %v1533_v2, %v562_v36  ;;  %v564_v50 = vsub.f32 %v436_v31, %v308_v30  ;;  %942 = vst [vmem:[%s1561_s24 + $0x208] sm:$0xff] %v814_v40  ;;  %943 = vst [vmem:[%s1561_s24 + $0x210] sm:$0xff] %v815_v41  ;;  %v817_v54 = vadd.f32 %v689_v42, %v304_v6  ;;  %v447_v22 = vld [vmem:[%s1525_s10 + $0x298] sm:$0xff]  ;;  %v320_v23 = vld [vmem:[%s1517_s8 + $0x2a0] sm:$0xff] }
  0x8e   : > { %v818_v55 = vadd.f32 %v690_v43, %v305_v12  ;;  %v565_v56 = vsub.f32 %v437_v37, %v309_v32  ;;  %v566_v57 = vsub.f32 %v438_v39, %v310_v38  ;;  %944 = vst [vmem:[%s1561_s24 + $0x218] sm:$0xff] %v816_v47  ;;  %v692_v61 = vmul.f32 %v1533_v2, %v563_v49  ;;  %v448_v28 = vld [vmem:[%s1525_s10 + $0x2a0] sm:$0xff]  ;;  %v321_v29 = vld [vmem:[%s1517_s8 + $0x2a8] sm:$0xff]  ;;  %v322_v35 = vld [vmem:[%s1517_s8 + $0x2b0] sm:$0xff] }
  0x8f   : > { %v819_v60 = vadd.f32 %v691_v48, %v306_v18  ;;  %v693_v62 = vmul.f32 %v1533_v2, %v564_v50  ;;  %v567_v63 = vsub.f32 %v439_v45, %v311_v44  ;;  %945 = vst [vmem:[%s1561_s24 + $0x220] sm:$0xff] %v817_v54  ;;  %v568_v5 = vsub.f32 %v440_v51, %v312_v46  ;;  %v450_v36 = vld [vmem:[%s1525_s10 + $0x2b0] sm:$0xff]  ;;  %v323_v41 = vld [vmem:[%s1517_s8 + $0x2b8] sm:$0xff]  ;;  %v324_v47 = vld [vmem:[%s1517_s8 + $0x2c0] sm:$0xff] }
  0x90   : > { %946 = vst [vmem:[%s1561_s24 + $0x228] sm:$0xff] %v818_v55  ;;  %v694_v3 = vmul.f32 %v1533_v2, %v565_v56  ;;  %v695_v4 = vmul.f32 %v1533_v2, %v566_v57  ;;  %v569_v6 = vsub.f32 %v441_v53, %v313_v52  ;;  %v820_v10 = vadd.f32 %v692_v61, %v307_v24  ;;  %v451_v42 = vld [vmem:[%s1525_s10 + $0x2b8] sm:$0xff]  ;;  %v452_v48 = vld [vmem:[%s1525_s10 + $0x2c0] sm:$0xff]  ;;  %v325_v49 = vld [vmem:[%s1517_s8 + $0x2c8] sm:$0xff] }
  0x91   : > { %947 = vst [vmem:[%s1561_s24 + $0x230] sm:$0xff] %v819_v60  ;;  %v821_v11 = vadd.f32 %v693_v62, %v308_v30  ;;  %v696_v12 = vmul.f32 %v1533_v2, %v567_v63  ;;  %v570_v13 = vsub.f32 %v442_v59, %v314_v58  ;;  %v697_v19 = vmul.f32 %v1533_v2, %v568_v5  ;;  %v449_v30 = vld [vmem:[%s1525_s10 + $0x2a8] sm:$0xff]  ;;  %v326_v55 = vld [vmem:[%s1517_s8 + $0x2d0] sm:$0xff]  ;;  %v327_v61 = vld [vmem:[%s1517_s8 + $0x2d8] sm:$0xff] }
  0x92   : > { %v822_v17 = vadd.f32 %v694_v3, %v309_v32  ;;  %v823_v18 = vadd.f32 %v695_v4, %v310_v38  ;;  %v698_v20 = vmul.f32 %v1533_v2, %v569_v6  ;;  %948 = vst [vmem:[%s1561_s24 + $0x238] sm:$0xff] %v820_v10  ;;  %v571_v26 = vsub.f32 %v443_v1, %v315_v0  ;;  %v453_v54 = vld [vmem:[%s1525_s10 + $0x2c8] sm:$0xff]  ;;  %v454_v56 = vld [vmem:[%s1525_s10 + $0x2d0] sm:$0xff]  ;;  %v455_v62 = vld [vmem:[%s1525_s10 + $0x2d8] sm:$0xff] }
  0x93   : > { %949 = vst [vmem:[%s1561_s24 + $0x240] sm:$0xff] %v821_v11  ;;  %v824_v24 = vadd.f32 %v696_v12, %v311_v44  ;;  %v699_v25 = vmul.f32 %v1533_v2, %v570_v13  ;;  %v572_v27 = vsub.f32 %v444_v8, %v316_v7  ;;  %v825_v31 = vadd.f32 %v697_v19, %v312_v46  ;;  %v328_v63 = vld [vmem:[%s1517_s8 + $0x2e0] sm:$0xff]  ;;  %v329_v6 = vld [vmem:[%s1517_s8 + $0x2e8] sm:$0xff]  ;;  %v330_v12 = vld [vmem:[%s1517_s8 + $0x2f0] sm:$0xff] }
  0x94   : > { %950 = vst [vmem:[%s1561_s24 + $0x248] sm:$0xff] %v822_v17  ;;  %951 = vst [vmem:[%s1561_s24 + $0x250] sm:$0xff] %v823_v18  ;;  %v826_v32 = vadd.f32 %v698_v20, %v313_v52  ;;  %v573_v33 = vsub.f32 %v445_v14, %v317_v9  ;;  %v574_v34 = vsub.f32 %v446_v16, %v318_v15  ;;  %v456_v5 = vld [vmem:[%s1525_s10 + $0x2e0] sm:$0xff]  ;;  %v458_v13 = vld [vmem:[%s1525_s10 + $0x2f0] sm:$0xff] }
  0x95   : > { %952 = vst [vmem:[%s1561_s24 + $0x258] sm:$0xff] %v824_v24  ;;  %v827_v37 = vadd.f32 %v699_v25, %v314_v58  ;;  %v700_v38 = vmul.f32 %v1533_v2, %v571_v26  ;;  %v701_v39 = vmul.f32 %v1533_v2, %v572_v27  ;;  %v575_v40 = vsub.f32 %v447_v22, %v319_v21  ;;  %v331_v18 = vld [vmem:[%s1517_s8 + $0x2f8] sm:$0xff]  ;;  %v332_v24 = vld [vmem:[%s1517_s8 + $0x300] sm:$0xff]  ;;  %v333_v26 = vld [vmem:[%s1517_s8 + $0x308] sm:$0xff] }
  0x96   : > { %953 = vst [vmem:[%s1561_s24 + $0x260] sm:$0xff] %v825_v31  ;;  %954 = vst [vmem:[%s1561_s24 + $0x268] sm:$0xff] %v826_v32  ;;  %v702_v43 = vmul.f32 %v1533_v2, %v573_v33  ;;  %v703_v44 = vmul.f32 %v1533_v2, %v574_v34  ;;  %v576_v45 = vsub.f32 %v448_v28, %v320_v23  ;;  %v459_v19 = vld [vmem:[%s1525_s10 + $0x2f8] sm:$0xff]  ;;  %v460_v25 = vld [vmem:[%s1525_s10 + $0x300] sm:$0xff] }
  0x97   : > { %v577_v46 = vsub.f32 %v449_v30, %v321_v29  ;;  %955 = vst [vmem:[%s1561_s24 + $0x270] sm:$0xff] %v827_v37  ;;  %v828_v50 = vadd.f32 %v700_v38, %v315_v0  ;;  %v829_v51 = vadd.f32 %v701_v39, %v316_v7  ;;  %v704_v52 = vmul.f32 %v1533_v2, %v575_v40  ;;  %v457_v7 = vld [vmem:[%s1525_s10 + $0x2e8] sm:$0xff]  ;;  %v334_v32 = vld [vmem:[%s1517_s8 + $0x310] sm:$0xff]  ;;  %v335_v38 = vld [vmem:[%s1517_s8 + $0x318] sm:$0xff] }
  0x98   : > { %v578_v53 = vsub.f32 %v450_v36, %v322_v35  ;;  %v830_v57 = vadd.f32 %v702_v43, %v317_v9  ;;  %v831_v58 = vadd.f32 %v703_v44, %v318_v15  ;;  %v705_v59 = vmul.f32 %v1533_v2, %v576_v45  ;;  %v461_v31 = vld [vmem:[%s1525_s10 + $0x308] sm:$0xff]  ;;  %v462_v33 = vld [vmem:[%s1525_s10 + $0x310] sm:$0xff]  ;;  %v463_v39 = vld [vmem:[%s1525_s10 + $0x318] sm:$0xff] }
  0x99   : > { %v706_v60 = vmul.f32 %v1533_v2, %v577_v46  ;;  %956 = vst [vmem:[%s1561_s24 + $0x278] sm:$0xff] %v828_v50  ;;  %957 = vst [vmem:[%s1561_s24 + $0x280] sm:$0xff] %v829_v51  ;;  %v832_v0 = vadd.f32 %v704_v52, %v319_v21  ;;  %v579_v3 = vsub.f32 %v451_v42, %v323_v41  ;;  %v336_v40 = vld [vmem:[%s1517_s8 + $0x320] sm:$0xff]  ;;  %v337_v46 = vld [vmem:[%s1517_s8 + $0x328] sm:$0xff] }
  0x9a   : > { %v707_v1 = vmul.f32 %v1533_v2, %v578_v53  ;;  %v580_v4 = vsub.f32 %v452_v48, %v324_v47  ;;  %958 = vst [vmem:[%s1561_s24 + $0x288] sm:$0xff] %v830_v57  ;;  %959 = vst [vmem:[%s1561_s24 + $0x290] sm:$0xff] %v831_v58  ;;  %v833_v8 = vadd.f32 %v705_v59, %v320_v23  ;;  %v464_v45 = vld [vmem:[%s1525_s10 + $0x320] sm:$0xff]  ;;  %v338_v52 = vld [vmem:[%s1517_s8 + $0x330] sm:$0xff] }
  0x9b   : > { %v834_v9 = vadd.f32 %v706_v60, %v321_v29  ;;  %v581_v10 = vsub.f32 %v453_v54, %v325_v49  ;;  %v582_v11 = vsub.f32 %v454_v56, %v326_v55  ;;  %960 = vst [vmem:[%s1561_s24 + $0x298] sm:$0xff] %v832_v0  ;;  %v708_v15 = vmul.f32 %v1533_v2, %v579_v3  ;;  %v466_v53 = vld [vmem:[%s1525_s10 + $0x330] sm:$0xff]  ;;  %v339_v58 = vld [vmem:[%s1517_s8 + $0x338] sm:$0xff]  ;;  %v340_v0 = vld [vmem:[%s1517_s8 + $0x340] sm:$0xff] }
  0x9c   : > { %v835_v14 = vadd.f32 %v707_v1, %v322_v35  ;;  %v709_v16 = vmul.f32 %v1533_v2, %v580_v4  ;;  %v583_v17 = vsub.f32 %v455_v62, %v327_v61  ;;  %961 = vst [vmem:[%s1561_s24 + $0x2a0] sm:$0xff] %v833_v8  ;;  %v584_v22 = vsub.f32 %v456_v5, %v328_v63  ;;  %v467_v59 = vld [vmem:[%s1525_s10 + $0x338] sm:$0xff]  ;;  %v468_v1 = vld [vmem:[%s1525_s10 + $0x340] sm:$0xff]  ;;  %v341_v3 = vld [vmem:[%s1517_s8 + $0x348] sm:$0xff] }
  0x9d   : > { %962 = vst [vmem:[%s1561_s24 + $0x2a8] sm:$0xff] %v834_v9  ;;  %v710_v20 = vmul.f32 %v1533_v2, %v581_v10  ;;  %v711_v21 = vmul.f32 %v1533_v2, %v582_v11  ;;  %v585_v23 = vsub.f32 %v457_v7, %v329_v6  ;;  %v836_v27 = vadd.f32 %v708_v15, %v323_v41  ;;  %v469_v8 = vld [vmem:[%s1525_s10 + $0x348] sm:$0xff]  ;;  %v342_v9 = vld [vmem:[%s1517_s8 + $0x350] sm:$0xff]  ;;  %v343_v15 = vld [vmem:[%s1517_s8 + $0x358] sm:$0xff] }
  0x9e   : > { %963 = vst [vmem:[%s1561_s24 + $0x2b0] sm:$0xff] %v835_v14  ;;  %v837_v28 = vadd.f32 %v709_v16, %v324_v47  ;;  %v712_v29 = vmul.f32 %v1533_v2, %v583_v17  ;;  %v586_v30 = vsub.f32 %v458_v13, %v330_v12  ;;  %v713_v36 = vmul.f32 %v1533_v2, %v584_v22  ;;  %v465_v47 = vld [vmem:[%s1525_s10 + $0x328] sm:$0xff]  ;;  %v470_v10 = vld [vmem:[%s1525_s10 + $0x350] sm:$0xff]  ;;  %v471_v16 = vld [vmem:[%s1525_s10 + $0x358] sm:$0xff] }
  0x9f   : > { %v838_v34 = vadd.f32 %v710_v20, %v325_v49  ;;  %v839_v35 = vadd.f32 %v711_v21, %v326_v55  ;;  %v714_v37 = vmul.f32 %v1533_v2, %v585_v23  ;;  %964 = vst [vmem:[%s1561_s24 + $0x2b8] sm:$0xff] %v836_v27  ;;  %v587_v43 = vsub.f32 %v459_v19, %v331_v18  ;;  %v344_v17 = vld [vmem:[%s1517_s8 + $0x360] sm:$0xff]  ;;  %v345_v23 = vld [vmem:[%s1517_s8 + $0x368] sm:$0xff] }
  0xa0   : > { %965 = vst [vmem:[%s1561_s24 + $0x2c0] sm:$0xff] %v837_v28  ;;  %v840_v41 = vadd.f32 %v712_v29, %v327_v61  ;;  %v715_v42 = vmul.f32 %v1533_v2, %v586_v30  ;;  %v588_v44 = vsub.f32 %v460_v25, %v332_v24  ;;  %v841_v48 = vadd.f32 %v713_v36, %v328_v63  ;;  %v472_v22 = vld [vmem:[%s1525_s10 + $0x360] sm:$0xff]  ;;  %v346_v29 = vld [vmem:[%s1517_s8 + $0x370] sm:$0xff]  ;;  %v475_v36 = vld [vmem:[%s1525_s10 + $0x378] sm:$0xff] }
  0xa1   : > { %966 = vst [vmem:[%s1561_s24 + $0x2c8] sm:$0xff] %v838_v34  ;;  %967 = vst [vmem:[%s1561_s24 + $0x2d0] sm:$0xff] %v839_v35  ;;  %v842_v49 = vadd.f32 %v714_v37, %v329_v6  ;;  %v589_v50 = vsub.f32 %v461_v31, %v333_v26  ;;  %v590_v51 = vsub.f32 %v462_v33, %v334_v32  ;;  %v474_v30 = vld [vmem:[%s1525_s10 + $0x370] sm:$0xff]  ;;  %v347_v35 = vld [vmem:[%s1517_s8 + $0x378] sm:$0xff] }
  0xa2   : > { %968 = vst [vmem:[%s1561_s24 + $0x2d8] sm:$0xff] %v840_v41  ;;  %v843_v54 = vadd.f32 %v715_v42, %v330_v12  ;;  %v716_v55 = vmul.f32 %v1533_v2, %v587_v43  ;;  %v717_v56 = vmul.f32 %v1533_v2, %v588_v44  ;;  %v591_v57 = vsub.f32 %v463_v39, %v335_v38  ;;  %v348_v41 = vld [vmem:[%s1517_s8 + $0x380] sm:$0xff]  ;;  %v349_v43 = vld [vmem:[%s1517_s8 + $0x388] sm:$0xff] }
  0xa3   : > { %969 = vst [vmem:[%s1561_s24 + $0x2e0] sm:$0xff] %v841_v48  ;;  %970 = vst [vmem:[%s1561_s24 + $0x2e8] sm:$0xff] %v842_v49  ;;  %v718_v60 = vmul.f32 %v1533_v2, %v589_v50  ;;  %v719_v61 = vmul.f32 %v1533_v2, %v590_v51  ;;  %v592_v62 = vsub.f32 %v464_v45, %v336_v40  ;;  %v476_v42 = vld [vmem:[%s1525_s10 + $0x380] sm:$0xff]  ;;  %v477_v48 = vld [vmem:[%s1525_s10 + $0x388] sm:$0xff] }
  0xa4   : > { %v593_v63 = vsub.f32 %v465_v47, %v337_v46  ;;  %971 = vst [vmem:[%s1561_s24 + $0x2f0] sm:$0xff] %v843_v54  ;;  %v844_v4 = vadd.f32 %v716_v55, %v331_v18  ;;  %v845_v5 = vadd.f32 %v717_v56, %v332_v24  ;;  %v720_v6 = vmul.f32 %v1533_v2, %v591_v57  ;;  %v473_v24 = vld [vmem:[%s1525_s10 + $0x368] sm:$0xff]  ;;  %v350_v49 = vld [vmem:[%s1517_s8 + $0x390] sm:$0xff]  ;;  %v351_v55 = vld [vmem:[%s1517_s8 + $0x398] sm:$0xff] }
  0xa5   : > { %v594_v7 = vsub.f32 %v466_v53, %v338_v52  ;;  %v846_v11 = vadd.f32 %v718_v60, %v333_v26  ;;  %v847_v12 = vadd.f32 %v719_v61, %v334_v32  ;;  %v721_v13 = vmul.f32 %v1533_v2, %v592_v62  ;;  %v478_v50 = vld [vmem:[%s1525_s10 + $0x390] sm:$0xff]  ;;  %v479_v56 = vld [vmem:[%s1525_s10 + $0x398] sm:$0xff]  ;;  %v352_v57 = vld [vmem:[%s1517_s8 + $0x3a0] sm:$0xff] }
  0xa6   : > { %v722_v14 = vmul.f32 %v1533_v2, %v593_v63  ;;  %972 = vst [vmem:[%s1561_s24 + $0x2f8] sm:$0xff] %v844_v4  ;;  %973 = vst [vmem:[%s1561_s24 + $0x300] sm:$0xff] %v845_v5  ;;  %v848_v18 = vadd.f32 %v720_v6, %v335_v38  ;;  %v595_v20 = vsub.f32 %v467_v59, %v339_v58  ;;  %v480_v62 = vld [vmem:[%s1525_s10 + $0x3a0] sm:$0xff]  ;;  %v353_v63 = vld [vmem:[%s1517_s8 + $0x3a8] sm:$0xff] }
  0xa7   : > { %v723_v19 = vmul.f32 %v1533_v2, %v594_v7  ;;  %v596_v21 = vsub.f32 %v468_v1, %v340_v0  ;;  %974 = vst [vmem:[%s1561_s24 + $0x308] sm:$0xff] %v846_v11  ;;  %975 = vst [vmem:[%s1561_s24 + $0x310] sm:$0xff] %v847_v12  ;;  %v849_v25 = vadd.f32 %v721_v13, %v336_v40  ;;  %v354_v6 = vld [vmem:[%s1517_s8 + $0x3b0] sm:$0xff]  ;;  %v355_v12 = vld [vmem:[%s1517_s8 + $0x3b8] sm:$0xff] }
  0xa8   : > { %v850_v26 = vadd.f32 %v722_v14, %v337_v46  ;;  %v597_v27 = vsub.f32 %v469_v8, %v341_v3  ;;  %v598_v28 = vsub.f32 %v470_v10, %v342_v9  ;;  %976 = vst [vmem:[%s1561_s24 + $0x318] sm:$0xff] %v848_v18  ;;  %v724_v32 = vmul.f32 %v1533_v2, %v595_v20  ;;  %v482_v7 = vld [vmem:[%s1525_s10 + $0x3b0] sm:$0xff]  ;;  %v483_v13 = vld [vmem:[%s1525_s10 + $0x3b8] sm:$0xff]  ;;  %v356_v18 = vld [vmem:[%s1517_s8 + $0x3c0] sm:$0xff] }
  0xa9   : > { %v851_v31 = vadd.f32 %v723_v19, %v338_v52  ;;  %v725_v33 = vmul.f32 %v1533_v2, %v596_v21  ;;  %v599_v34 = vsub.f32 %v471_v16, %v343_v15  ;;  %977 = vst [vmem:[%s1561_s24 + $0x320] sm:$0xff] %v849_v25  ;;  %v600_v39 = vsub.f32 %v472_v22, %v344_v17  ;;  %v484_v19 = vld [vmem:[%s1525_s10 + $0x3c0] sm:$0xff]  ;;  %v357_v20 = vld [vmem:[%s1517_s8 + $0x3c8] sm:$0xff] }
  0xaa   : > { %978 = vst [vmem:[%s1561_s24 + $0x328] sm:$0xff] %v850_v26  ;;  %v726_v37 = vmul.f32 %v1533_v2, %v597_v27  ;;  %v727_v38 = vmul.f32 %v1533_v2, %v598_v28  ;;  %v601_v40 = vsub.f32 %v473_v24, %v345_v23  ;;  %v852_v44 = vadd.f32 %v724_v32, %v339_v58  ;;  %v485_v25 = vld [vmem:[%s1525_s10 + $0x3c8] sm:$0xff]  ;;  %v358_v26 = vld [vmem:[%s1517_s8 + $0x3d0] sm:$0xff]  ;;  %v359_v32 = vld [vmem:[%s1517_s8 + $0x3d8] sm:$0xff] }
  0xab   : > { %979 = vst [vmem:[%s1561_s24 + $0x330] sm:$0xff] %v851_v31  ;;  %v853_v45 = vadd.f32 %v725_v33, %v340_v0  ;;  %v728_v46 = vmul.f32 %v1533_v2, %v599_v34  ;;  %v602_v47 = vsub.f32 %v474_v30, %v346_v29  ;;  %v729_v53 = vmul.f32 %v1533_v2, %v600_v39  ;;  %v481_v0 = vld [vmem:[%s1525_s10 + $0x3a8] sm:$0xff]  ;;  %v486_v27 = vld [vmem:[%s1525_s10 + $0x3d0] sm:$0xff]  ;;  %v487_v33 = vld [vmem:[%s1525_s10 + $0x3d8] sm:$0xff] }
  0xac   : > { %v854_v51 = vadd.f32 %v726_v37, %v341_v3  ;;  %v855_v52 = vadd.f32 %v727_v38, %v342_v9  ;;  %v730_v54 = vmul.f32 %v1533_v2, %v601_v40  ;;  %980 = vst [vmem:[%s1561_s24 + $0x338] sm:$0xff] %v852_v44  ;;  %v603_v60 = vsub.f32 %v475_v36, %v347_v35  ;;  %v360_v34 = vld [vmem:[%s1517_s8 + $0x3e0] sm:$0xff]  ;;  %v361_v40 = vld [vmem:[%s1517_s8 + $0x3e8] sm:$0xff] }
  0xad   : > { %981 = vst [vmem:[%s1561_s24 + $0x340] sm:$0xff] %v853_v45  ;;  %v856_v58 = vadd.f32 %v728_v46, %v343_v15  ;;  %v731_v59 = vmul.f32 %v1533_v2, %v602_v47  ;;  %v604_v61 = vsub.f32 %v476_v42, %v348_v41  ;;  %v857_v1 = vadd.f32 %v729_v53, %v344_v17  ;;  %v488_v39 = vld [vmem:[%s1525_s10 + $0x3e0] sm:$0xff]  ;;  %v362_v46 = vld [vmem:[%s1517_s8 + $0x3f0] sm:$0xff] }
  0xae   : > { %982 = vst [vmem:[%s1561_s24 + $0x348] sm:$0xff] %v854_v51  ;;  %983 = vst [vmem:[%s1561_s24 + $0x350] sm:$0xff] %v855_v52  ;;  %v858_v3 = vadd.f32 %v730_v54, %v345_v23  ;;  %v605_v4 = vsub.f32 %v477_v48, %v349_v43  ;;  %v606_v5 = vsub.f32 %v478_v50, %v350_v49  ;;  %v490_v47 = vld [vmem:[%s1525_s10 + $0x3f0] sm:$0xff] }
  0xaf   : > { %984 = vst [vmem:[%s1561_s24 + $0x358] sm:$0xff] %v856_v58  ;;  %v859_v8 = vadd.f32 %v731_v59, %v346_v29  ;;  %v732_v9 = vmul.f32 %v1533_v2, %v603_v60  ;;  %v733_v10 = vmul.f32 %v1533_v2, %v604_v61  ;;  %v607_v11 = vsub.f32 %v479_v56, %v351_v55  ;;  %v363_v56 = vld [vmem:[%s1517_s8 + $0x3f8] sm:$0xff] }
  0xb0   : > { %985 = vst [vmem:[%s1561_s24 + $0x360] sm:$0xff] %v857_v1  ;;  %986 = vst [vmem:[%s1561_s24 + $0x368] sm:$0xff] %v858_v3  ;;  %v734_v14 = vmul.f32 %v1533_v2, %v605_v4  ;;  %v735_v15 = vmul.f32 %v1533_v2, %v606_v5  ;;  %v608_v16 = vsub.f32 %v480_v62, %v352_v57 }
  0xb1   : > { %v609_v17 = vsub.f32 %v481_v0, %v353_v63  ;;  %987 = vst [vmem:[%s1561_s24 + $0x370] sm:$0xff] %v859_v8  ;;  %v860_v21 = vadd.f32 %v732_v9, %v347_v35  ;;  %v861_v22 = vadd.f32 %v733_v10, %v348_v41  ;;  %v736_v23 = vmul.f32 %v1533_v2, %v607_v11  ;;  %v489_v41 = vld [vmem:[%s1525_s10 + $0x3e8] sm:$0xff] }
  0xb2   : > { %v610_v24 = vsub.f32 %v482_v7, %v354_v6  ;;  %v862_v28 = vadd.f32 %v734_v14, %v349_v43  ;;  %v863_v29 = vadd.f32 %v735_v15, %v350_v49  ;;  %v737_v30 = vmul.f32 %v1533_v2, %v608_v16 }
  0xb3   : > { %v738_v31 = vmul.f32 %v1533_v2, %v609_v17  ;;  %988 = vst [vmem:[%s1561_s24 + $0x378] sm:$0xff] %v860_v21  ;;  %989 = vst [vmem:[%s1561_s24 + $0x380] sm:$0xff] %v861_v22  ;;  %v864_v35 = vadd.f32 %v736_v23, %v351_v55  ;;  %v611_v37 = vsub.f32 %v483_v13, %v355_v12 }
  0xb4   : > { %v739_v36 = vmul.f32 %v1533_v2, %v610_v24  ;;  %v612_v38 = vsub.f32 %v484_v19, %v356_v18  ;;  %990 = vst [vmem:[%s1561_s24 + $0x388] sm:$0xff] %v862_v28  ;;  %991 = vst [vmem:[%s1561_s24 + $0x390] sm:$0xff] %v863_v29  ;;  %v865_v42 = vadd.f32 %v737_v30, %v352_v57  ;;  %v491_v57 = vld [vmem:[%s1525_s10 + $0x3f8] sm:$0xff] }
  0xb5   : > { %v866_v43 = vadd.f32 %v738_v31, %v353_v63  ;;  %v613_v44 = vsub.f32 %v485_v25, %v357_v20  ;;  %v614_v45 = vsub.f32 %v486_v27, %v358_v26  ;;  %992 = vst [vmem:[%s1561_s24 + $0x398] sm:$0xff] %v864_v35  ;;  %v740_v49 = vmul.f32 %v1533_v2, %v611_v37 }
  0xb6   : > { %v867_v48 = vadd.f32 %v739_v36, %v354_v6  ;;  %v741_v50 = vmul.f32 %v1533_v2, %v612_v38  ;;  %v615_v51 = vsub.f32 %v487_v33, %v359_v32  ;;  %993 = vst [vmem:[%s1561_s24 + $0x3a0] sm:$0xff] %v865_v42  ;;  %v616_v54 = vsub.f32 %v488_v39, %v360_v34 }
  0xb7   : > { %994 = vst [vmem:[%s1561_s24 + $0x3a8] sm:$0xff] %v866_v43  ;;  %v742_v52 = vmul.f32 %v1533_v2, %v613_v44  ;;  %v743_v53 = vmul.f32 %v1533_v2, %v614_v45  ;;  %v617_v55 = vsub.f32 %v489_v41, %v361_v40  ;;  %v868_v58 = vadd.f32 %v740_v49, %v355_v12 }
  0xb8   : > { %995 = vst [vmem:[%s1561_s24 + $0x3b0] sm:$0xff] %v867_v48  ;;  %v869_v59 = vadd.f32 %v741_v50, %v356_v18  ;;  %v744_v60 = vmul.f32 %v1533_v2, %v615_v51  ;;  %v618_v61 = vsub.f32 %v490_v47, %v362_v46  ;;  %v745_v0 = vmul.f32 %v1533_v2, %v616_v54 }
  0xb9   : > { %v870_v62 = vadd.f32 %v742_v52, %v357_v20  ;;  %v871_v63 = vadd.f32 %v743_v53, %v358_v26  ;;  %v746_v1 = vmul.f32 %v1533_v2, %v617_v55  ;;  %996 = vst [vmem:[%s1561_s24 + $0x3b8] sm:$0xff] %v868_v58  ;;  %v619_v5 = vsub.f32 %v491_v57, %v363_v56 }
  0xba   : > { %997 = vst [vmem:[%s1561_s24 + $0x3c0] sm:$0xff] %v869_v59  ;;  %v872_v3 = vadd.f32 %v744_v60, %v359_v32  ;;  %v747_v4 = vmul.f32 %v1533_v2, %v618_v61  ;;  %v873_v6 = vadd.f32 %v745_v0, %v360_v34 }
  0xbb   : > { %998 = vst [vmem:[%s1561_s24 + $0x3c8] sm:$0xff] %v870_v62  ;;  %999 = vst [vmem:[%s1561_s24 + $0x3d0] sm:$0xff] %v871_v63  ;;  %v874_v7 = vadd.f32 %v746_v1, %v361_v40  ;;  %v748_v9 = vmul.f32 %v1533_v2, %v619_v5 }
  0xbc   : > { %1000 = vst [vmem:[%s1561_s24 + $0x3d8] sm:$0xff] %v872_v3  ;;  %v875_v8 = vadd.f32 %v747_v4, %v362_v46  ;;  %1001 = vst [vmem:[%s1561_s24 + $0x3e0] sm:$0xff] %v873_v6 }
  0xbd   : > { %1002 = vst [vmem:[%s1561_s24 + $0x3e8] sm:$0xff] %v874_v7  ;;  %v876_v10 = vadd.f32 %v748_v9, %v363_v56 }
  0xbe   : > { %1003 = vst [vmem:[%s1561_s24 + $0x3f0] sm:$0xff] %v875_v8 }
  0xbf   : > { %1004 = vst [vmem:[%s1561_s24 + $0x3f8] sm:$0xff] %v876_v10 }
  0xc0   : > { %1267 = shalt.err (!%p1264_p4)
}
  0xc1   : > { %s1268_s12 = scalar_lea.hbm %s2051_s28, 16384  ;;  %s1272_s9 = scalar_lea.hbm %s2101_s3, 32768 }
  0xc2   : > { %p1269_p9 = scmp.ne.s32.totalorder %s2051_s28, %s1268_s12  ;;  %p1273_p5 = scmp.lt.s32.totalorder %s2051_s28, %s2101_s3 }
  0xc3   : > { %p1274_p8 = scmp.lt.s32.totalorder %s1272_s9, %s1268_s12 }
  0xc4   : > { %p1270_p11 = pnand %p1269_p9, %p2111_p1 }
  0xc5   : > { %p1275_p6 = por %p1274_p8, %p1273_p5 }
  0xc6   : > { %p1271_p3 = pneg %p1270_p11 }
  0xc8   : > { %p1276_p13 = pnand %p1275_p6, %p1271_p3 }
  0xca   : > { %1279 = shalt.err (!%p1276_p13)
}
  0xcb   : > { %s1329_s10 = smov 1024   ;;  %s1330_s11 = smov 64  }
  0xcc   : > { %1147 = dma.vmem_to_hbm [thread:$0]  (%p2111_p1), %s2053_s21, 16384, %s2051_s28, %s1006_s0, %s1329_s10, %s1329_s10, %s1330_s11  }
  0xcd PF: > { %s1035_s24 = sand.u32 1, %s1310_s14   ;;  %p2112_p12 = scmp.ne.s32.totalorder %s2107_s26, 0 }
  0xce   : > { %p2113_p7 = scmp.ge.s32.totalorder %s1322_s17, 2  ;;  %s1036_s18 = scalar_lea.sflag [#allocation5], %s1035_s24 }
  0xd0   : > { %p1157_p10 = pnand %p2113_p7, %p2112_p12 }
  0xd2   : > { %p1158_p0 = pneg %p1157_p10 }
  0xd4   : > { %1305 = dma.done.wait (%p1158_p0), %s1036_s18, 16384  }
  0xd5   : > { %1307 = vsyncadd (%p1158_p0), %s1036_s18, 4294950912  ;;  %p20_p2 = scmp.ge.s32.totalorder %s1379_s19, 4   ;;  %s2114_s14 = smov %s1314_s15 }
  0xd6   : > { %s2115_s15 = smov %s1318_s16  ;;  %s2116_s16 = smov %s1391_s22 }
  0xd7   : > { %s2117_s17 = smov %s1379_s19  ;;  %22 = sbr.rel (!%p20_p2) target bundleno = 9 (0x9), region = 90 }
  0xdc   :  { %1041 = vsyncpa [#allocation4], 1 }
  0xdd   :  { %1043 = vsyncpa [#allocation4 + $0x1], 1 }
  0xde   :  { %1044 = vsyncpa [#allocation7], 1 }
  0xdf   :  { %1046 = vsyncpa [#allocation7 + $0x1], 1 }
  0xe0   :  { %1047 = vsyncpa [#allocation5], 1 }
  0xe1   :  { %1049 = vsyncpa [#allocation5 + $0x1], 1 }

</bundles_post_ra>
